<compile_context>
chip_gen: v6e
topology: v6e:2x2x1
jax: 0.10.0
libtpu: 0.0.40
codegen_flags: <defaults>
</compile_context>

<pallas_src>
import functools

import jax
import jax.numpy as jnp
from jax.experimental import pallas as pl
from jax.experimental.pallas import tpu as pltpu


def _round_up(x, m):
    return ((x + m - 1) // m) * m


# ----------------------------------------------------------------------------
# Pallas kernel: in-VMEM framing + fused (window * frame) rDFT as one matmul
# ----------------------------------------------------------------------------
def _make_freq_kernel(window_length, tile_l):
    wl, tl = window_length, tile_l

    def kernel(a_ref, b_ref, w_ref, o_ref):
        # a_ref: (1, tl, D)    reflect-padded sequence rows [li*tl, (li+1)*tl)
        # b_ref: (1, tb, D)    next tb >= wl-1 rows (frame overlap tail)
        # w_ref: (wl*D, D*2F)  block-diagonal windowed real-DFT matrix (resident)
        # o_ref: (1, tl, D*2F) columns ordered (d, [Re_0..Re_{F-1}, Im_0..Im_{F-1}])
        seq2 = jnp.concatenate([a_ref[0], b_ref[0]], axis=0)        # (tl+tb, D)
        # im2col entirely in VMEM: frame columns ordered (n, d)
        frames = jnp.concatenate(
            [seq2[n:n + tl, :] for n in range(wl)], axis=-1)         # (tl, wl*D)
        o_ref[0] = jnp.dot(
            frames, w_ref[...], preferred_element_type=jnp.float32
        ).astype(o_ref.dtype)

    return kernel


# ----------------------------------------------------------------------------
# Wrapper glue: window/DFT weight construction, padding, standardization
# ----------------------------------------------------------------------------
def _choose_window(window, window_length):
    assert window in ('hamming', 'hanning', 'rect')
    n = jnp.arange(window_length, dtype=jnp.float32)
    if window == 'hamming':
        return 0.54 - 0.46 * jnp.cos(2.0 * jnp.pi * n / (window_length - 1))
    if window == 'hanning':
        return 0.5 - 0.5 * jnp.cos(2.0 * jnp.pi * n / (window_length - 1))
    return jnp.ones((window_length,), jnp.float32)


def _windowed_rdft_matrix(window_length, window, num_vars):
    # Real-DFT matrix with the analysis window folded in, replicated per
    # variable as a block-diagonal so D rides in the kernel's lane dimension.
    # NOTE: this weight scales as D^2; for very large D switch to per-variable
    # row tiling with the small (wl, 2F) weight instead.
    wl = window_length
    f = wl // 2 + 1
    win = _choose_window(window, wl)                       # (wl,)
    n = jnp.arange(wl, dtype=jnp.float32)[:, None]
    k = jnp.arange(f, dtype=jnp.float32)[None, :]
    ang = 2.0 * jnp.pi * n * k / wl
    wr = win[:, None] * jnp.cos(ang)                       # (wl, F)
    wi = -win[:, None] * jnp.sin(ang)                      # (wl, F)
    w_small = jnp.concatenate([wr, wi], axis=1)            # (wl, 2F)
    eye = jnp.eye(num_vars, dtype=jnp.float32)             # (D, D)
    w_big = w_small[:, None, None, :] * eye[None, :, :, None]  # (wl, Din, Dout, 2F)
    return w_big.reshape(wl * num_vars, num_vars * 2 * f)


def _complex_standardization(re, im, dims, eps=1e-5):
    # TODO(synk): complex_standardization(..., method='Normalization') is
    # referenced but not defined in the source; implemented as complex
    # mean/RMS standardization over `dims`.
    mean_re = jnp.mean(re, axis=dims, keepdims=True)
    mean_im = jnp.mean(im, axis=dims, keepdims=True)
    re_c = re - mean_re
    im_c = im - mean_im
    std = jnp.sqrt(
        jnp.mean(re_c * re_c + im_c * im_c, axis=dims, keepdims=True)) + eps
    return re_c / std, im_c / std


def freq_embedding_forward(seq, *, window_length, window='hanning', tile_l=512):
    """FreqEmbedding.forward: seq (B, L, D) -> amplitude cube (B, L, wl//2+1, D)."""
    b, l, d = seq.shape
    wl = window_length
    f = wl // 2 + 1
    n_out = d * 2 * f

    seq = seq.astype(jnp.float32)
    pad = wl // 2                                           # ReflectionPad1d(wl/2)
    seq_pad = jnp.pad(seq, ((0, 0), (pad, pad), (0, 0)), mode='reflect')

    # ---- L tiling: tl rows per step, tb-row overlap tail (tb >= wl-1) ------
    tb = _round_up(max(wl - 1, 1), 8)
    tl = max(8, min(int(tile_l), _round_up(l, 8)))
    tl = _round_up(tl, tb)                                  # tl % tb == 0, tl >= wl-1

    def vmem_bytes(t):
        # double-buffered input streams + output + resident weight + intermediates
        return 4 * (2 * t * d + 2 * tb * d + 2 * t * n_out
                    + 2 * (wl * d) * n_out
                    + t * (wl * d) + (t + tb) * d + t * n_out)

    vmem_budget = 12 * 1024 * 1024                          # fits every generation
    while tl > tb and vmem_bytes(tl) > vmem_budget:
        tl = _round_up(max(tl // 2, tb), tb)

    n_lt = pl.cdiv(l, tl)
    lt_total = n_lt * tl + tb                               # rows the kernel indexes
    cur = seq_pad.shape[1]
    if lt_total > cur:
        seq_pad = jnp.pad(seq_pad, ((0, 0), (0, lt_total - cur), (0, 0)))

    w_mat = _windowed_rdft_matrix(wl, window, d)            # (wl*D, D*2F)

    vmem_limit = int(min(max(2 * vmem_bytes(tl) + (1 << 20),
                             16 * 1024 * 1024),
                         48 * 1024 * 1024))
    stride_b = tl // tb                                     # tail-block index stride

    out = pl.pallas_call(
        _make_freq_kernel(wl, tl),
        out_shape=jax.ShapeDtypeStruct((b, n_lt * tl, n_out), jnp.float32),
        grid_spec=pltpu.PrefetchScalarGridSpec(
            num_scalar_prefetch=0,
            grid=(b, n_lt),
            in_specs=[
                # main (tl, D) block of the padded sequence
                pl.BlockSpec((1, tl, d), lambda bi, li: (bi, li, 0)),
                # tiny overlap tail: rows [(li+1)*tl, (li+1)*tl + tb)
                pl.BlockSpec((1, tb, d),
                             lambda bi, li: (bi, (li + 1) * stride_b, 0)),
                # resident block-diagonal windowed DFT weight
                pl.BlockSpec((wl * d, n_out), lambda bi, li: (0, 0)),
            ],
            out_specs=pl.BlockSpec((1, tl, n_out), lambda bi, li: (bi, li, 0)),
        ),
        compiler_params=pltpu.CompilerParams(
            dimension_semantics=("parallel", "parallel"),
            vmem_limit_bytes=vmem_limit,
        ),
    )(seq_pad, seq_pad, w_mat)

    out = out[:, :l, :].reshape(b, l, d, 2 * f)
    re, im = out[..., :f], out[..., f:]                     # (B, L, D, F)

    # complex_standardization over dims (1, 2) of (B, L, F, D) == (L, freq),
    # which are dims (1, 3) in this (B, L, D, F) layout.
    re_n, im_n = _complex_standardization(re, im, dims=(1, 3))
    amp = jnp.sqrt(re_n * re_n + im_n * im_n)               # (B, L, D, F)
    return jnp.transpose(amp, (0, 1, 3, 2))                 # (B, L, F, D)


# ----------------------------------------------------------------------------
# Pure-JAX reference (uses jnp.fft.rfft) for correctness checking
# ----------------------------------------------------------------------------
def _reference_forward(seq, *, window_length, window):
    b, l, d = seq.shape
    pad = window_length // 2
    win = _choose_window(window, window_length)
    seq_pad = jnp.pad(seq, ((0, 0), (pad, pad), (0, 0)), mode='reflect')
    frames = jnp.stack(
        [seq_pad[:, i:i + window_length, :] for i in range(l)], axis=1
    )                                                      # (B, L, wl, D)
    frames = frames * win[None, None, :, None]
    cube = jnp.fft.rfft(frames, axis=-2)                   # (B, L, F, D)
    mean = jnp.mean(cube, axis=(1, 2), keepdims=True)
    zc = cube - mean
    std = jnp.sqrt(jnp.mean(jnp.abs(zc) ** 2, axis=(1, 2), keepdims=True)) + 1e-5
    return jnp.abs(zc / std)


if __name__ == "__main__":
    B, L, D = 2, 16, 4          # batch, sequence length, num variables
    window_length = 8           # args.window_length (even; wl//2 < L for reflect pad)
    window = 'hanning'          # args.window
    F = window_length // 2 + 1

    key = jax.random.PRNGKey(0)
    seq = jax.random.normal(key, (B, L, D), jnp.float32)

    fwd = jax.jit(functools.partial(
        freq_embedding_forward, window_length=window_length, window=window))
    out = jax.block_until_ready(fwd(seq))
    assert out.shape == (B, L, F, D), out.shape

    ref = _reference_forward(seq, window_length=window_length, window=window)
    assert jnp.allclose(out, ref, rtol=2e-2, atol=2e-2), (
        "kernel mismatch, max abs err = %f" % float(jnp.max(jnp.abs(out - ref))))

    print("KERNEL_OK")
</pallas_src>

<mosaic_0001>
module attributes {stable_mosaic.version = 11 : i64} {
  func.func @kernel(%arg0: i32, %arg1: i32, %arg2: memref<1x16x4xf32, #tpu.memory_space<vmem>>, %arg3: memref<1x8x4xf32, #tpu.memory_space<vmem>>, %arg4: memref<32x40xf32, #tpu.memory_space<vmem>>, %arg5: memref<1x16x40xf32, #tpu.memory_space<vmem>>) attributes {dimension_semantics = [#tpu.dimension_semantics<parallel>, #tpu.dimension_semantics<parallel>], iteration_bounds = array<i64: 2, 1>, scalar_prefetch = 0 : i64, scratch_operands = 0 : i64, tpu.core_type = #tpu.core_type<tc>, window_params = [{transform_indices = @transform_0, window_bounds = array<i64: 1, 16, 4>}, {transform_indices = @transform_1, window_bounds = array<i64: 1, 8, 4>}, {pipeline_mode = #tpu.pipeline_mode<synchronous>, transform_indices = @transform_2, window_bounds = array<i64: 32, 40>}, {transform_indices = @transform_3, window_bounds = array<i64: 1, 16, 40>}]} {
    %c0 = arith.constant 0 : index
    %c0_0 = arith.constant 0 : index
    %c0_1 = arith.constant 0 : index
    %0 = vector.load %arg2[%c0, %c0_0, %c0_1] : memref<1x16x4xf32, #tpu.memory_space<vmem>>, vector<1x16x4xf32>
    %1 = vector.shape_cast %0 : vector<1x16x4xf32> to vector<16x4xf32>
    %c0_2 = arith.constant 0 : index
    %c0_3 = arith.constant 0 : index
    %c0_4 = arith.constant 0 : index
    %2 = vector.load %arg3[%c0_2, %c0_3, %c0_4] : memref<1x8x4xf32, #tpu.memory_space<vmem>>, vector<1x8x4xf32>
    %3 = vector.shape_cast %2 : vector<1x8x4xf32> to vector<8x4xf32>
    %4 = tpu.concatenate %1, %3 in 0 : vector<16x4xf32>, vector<8x4xf32> -> vector<24x4xf32>
    %5 = vector.extract_strided_slice %4 {offsets = [0, 0], sizes = [16, 4], strides = [1, 1]} : vector<24x4xf32> to vector<16x4xf32>
    %6 = vector.extract_strided_slice %4 {offsets = [1, 0], sizes = [16, 4], strides = [1, 1]} : vector<24x4xf32> to vector<16x4xf32>
    %7 = vector.extract_strided_slice %4 {offsets = [2, 0], sizes = [16, 4], strides = [1, 1]} : vector<24x4xf32> to vector<16x4xf32>
    %8 = vector.extract_strided_slice %4 {offsets = [3, 0], sizes = [16, 4], strides = [1, 1]} : vector<24x4xf32> to vector<16x4xf32>
    %9 = vector.extract_strided_slice %4 {offsets = [4, 0], sizes = [16, 4], strides = [1, 1]} : vector<24x4xf32> to vector<16x4xf32>
    %10 = vector.extract_strided_slice %4 {offsets = [5, 0], sizes = [16, 4], strides = [1, 1]} : vector<24x4xf32> to vector<16x4xf32>
    %11 = vector.extract_strided_slice %4 {offsets = [6, 0], sizes = [16, 4], strides = [1, 1]} : vector<24x4xf32> to vector<16x4xf32>
    %12 = vector.extract_strided_slice %4 {offsets = [7, 0], sizes = [16, 4], strides = [1, 1]} : vector<24x4xf32> to vector<16x4xf32>
    %13 = tpu.concatenate %5, %6, %7, %8, %9, %10, %11, %12 in 1 : vector<16x4xf32>, vector<16x4xf32>, vector<16x4xf32>, vector<16x4xf32>, vector<16x4xf32>, vector<16x4xf32>, vector<16x4xf32>, vector<16x4xf32> -> vector<16x32xf32>
    %c0_5 = arith.constant 0 : index
    %c0_6 = arith.constant 0 : index
    %14 = vector.load %arg4[%c0_5, %c0_6] : memref<32x40xf32, #tpu.memory_space<vmem>>, vector<32x40xf32>
    %cst = arith.constant dense<0.000000e+00> : vector<16x40xf32>
    %15 = tpu.matmul %13, %14, %cst {dimension_numbers = #tpu.dot_dimension_numbers<[1], [0], [0], [1], [0, 0, 1, 1], [], []>} : vector<16x32xf32>, vector<32x40xf32>, vector<16x40xf32> -> vector<16x40xf32>
    %c0_7 = arith.constant 0 : index
    %c0_8 = arith.constant 0 : index
    %c0_9 = arith.constant 0 : index
    %16 = vector.load %arg5[%c0_7, %c0_8, %c0_9] : memref<1x16x40xf32, #tpu.memory_space<vmem>>, vector<1x16x40xf32>
    %17 = vector.shape_cast %16 : vector<1x16x40xf32> to vector<16x40xf32>
    %18 = vector.shape_cast %15 : vector<16x40xf32> to vector<1x16x40xf32>
    tpu.vector_store %arg5[%c0_7, %c0_8, %c0_9], %18 {strides = array<i32>} : memref<1x16x40xf32, #tpu.memory_space<vmem>>, vector<1x16x40xf32>,
    return
  }
  func.func @transform_0(%arg0: i32, %arg1: i32) -> (i32, i32, i32) {
    %c0_i32 = arith.constant 0 : i32
    %c0_i32_0 = arith.constant 0 : i32
    return %arg0, %arg1, %c0_i32 : i32, i32, i32
  }
  func.func @transform_1(%arg0: i32, %arg1: i32) -> (i32, i32, i32) {
    %c1_i32 = arith.constant 1 : i32
    %0 = arith.addi %arg1, %c1_i32 : i32
    %c2_i32 = arith.constant 2 : i32
    %1 = arith.muli %0, %c2_i32 : i32
    %c0_i32 = arith.constant 0 : i32
    %c0_i32_0 = arith.constant 0 : i32
    return %arg0, %1, %c0_i32 : i32, i32, i32
  }
  func.func @transform_2(%arg0: i32, %arg1: i32) -> (i32, i32) {
    %c0_i32 = arith.constant 0 : i32
    %c0_i32_0 = arith.constant 0 : i32
    %c0_i32_1 = arith.constant 0 : i32
    return %c0_i32, %c0_i32_0 : i32, i32
  }
  func.func @transform_3(%arg0: i32, %arg1: i32) -> (i32, i32, i32) {
    %c0_i32 = arith.constant 0 : i32
    %c0_i32_0 = arith.constant 0 : i32
    return %arg0, %arg1, %c0_i32 : i32, i32, i32
  }
}

</mosaic_0001>

<bundles_post_ra>
// kernel: freq_embedding_forward.1
= control target key start
LH: loop header
LB: loop body
LE: loop exit
PB: predicated region body
PF: predicated region fallthrough
CT: control target
= control target key end

     0   :  { %s698_s12 = smov 0   ;;  %s700_s13 = smov 0   ;;  %s789_s0 = inlined_call_operand.vmem [shape: f32[2,24,4], index: 0, kind: input, shape index: {}, may-alias: {0,1}]   ;;  %s790_s1 = inlined_call_operand.vmem [shape: f32[2,24,4], index: 1, kind: input, shape index: {}, may-alias: {0,1}]   ;;  %s791_s2 = inlined_call_operand.vmem [shape: f32[32,40], index: 2, kind: input, shape index: {}]   ;;  %s792_s3 = inlined_call_operand.vmem [shape: f32[2,16,40], index: 3, kind: output, shape index: {}]  }
   0x1   :  { %s702_s14 = smov 0  }
   0x2 LB: > { %s25_s15 = sadd.s32 1, %s665_s13  ;;  %p584_p0 = scmp.ge.s32.totalorder %s669_s14, 1  ;;  %s669_s14 = sphi %s702_s14, %s13_s14   ;;  %s665_s13 = sphi %s700_s13, %s794_s13   ;;  %s661_s12 = sphi %s698_s12, %s793_s12  }
   0x3   : > { %p27_p1 = scmp.ge.s32.totalorder %s25_s15, 2  ;;  %p189_p2 = scmp.lt.s32.totalorder %s669_s14, 3 }
   0x5   : > { %s796_s15 = smov (%p27_p1, %s25_s15), 0  ;;  %p190_p3 = pnand %p584_p0, %p189_p2 }
   0x6   : > { %p240_p4 = scmp.lt.s32.totalorder (!%p190_p3), %s661_s12, 1  ;;  %s671_s24 = smov (!%p190_p3), 8  }
   0x7   : > { %193 = sbr.rel (%p190_p3) target bundleno = 357 (0x165), region = 32  ;;  %s672_s25 = smov (!%p190_p3), 4  }
   0x8   : > { %s673_s28 = smov (!%p190_p3), 12   ;;  %s674_s6 = smov (!%p190_p3), 16  }
   0x9   : > { %s675_s9 = smov (!%p190_p3), 20   ;;  %s676_s10 = smov (!%p190_p3), 24  }
   0xa   : > { %s677_s11 = smov (!%p190_p3), 28  }
   0xc   : > { %s798_s12 = smov (!%p240_p4, %s661_s12), 1  ;;  %vm293_vm0 = vcmask 1045504   ;;  %vm281_vm1 = vcmask 1046528   ;;  %vm305_vm2 = vcmask 1044480   ;;  %vm317_vm3 = vcmask 1043456   ;;  %v389_v17 = vld [vmem:[%s791_s2 + $0x18] sm:$0xff] }
   0xd   : > { %s613_s16 = smul.u32 24, %s798_s12  ;;  %602 = vmatprep.subr.mxu0 %v389_v17  ;;  %v388_v22 = vld [vmem:[%s791_s2 + $0x10] sm:$0xff]  ;;  %v387_v23 = vld [vmem:[%s791_s2 + $0x8] sm:$0xff]  ;;  %vm329_vm4 = vcmask 1042432   ;;  %v386_v29 = vld [vmem:[%s791_s2] sm:$0xff]  ;;  %vm341_vm5 = vcmask 1041408  }
   0xe   : > { %603 = vmatpush3.msra.mxu0 %v389_v17  ;;  %vm353_vm6 = vcmask 1040384   ;;  %vm365_vm7 = vcmask 31744   ;;  %vm368_vm8 = vcmask 64512   ;;  %vm371_vm9 = vcmask 97280  }
   0xf   : > { %s247_s19 = scalar_lea.vmem %s789_s0, %s613_s16  ;;  %s594_s20 = sadd.s32 16, %s613_s16  ;;  %604 = vmatprep.subr.mxu0 %v388_v22  ;;  %vm374_vm10 = vcmask 130048   ;;  %vm377_vm11 = vcmask 162816   ;;  %vm380_vm12 = vcmask 195584   ;;  %vm383_vm13 = vcmask 228352  }
  0x10   : > { %v722_v0 = vld [vmem:[%s247_s19] sm:$0xff]  ;;  %v724_v1 = vld [vmem:[%s247_s19 + $0x8] sm:$0xff]  ;;  %s262_s23 = scalar_lea.vmem %s790_s1, %s594_s20  ;;  %605 = vmatpush3.msra.mxu0 %v388_v22  ;;  %vm390_vm14 = vcmask 261120   ;;  %s595_s16 = sshll.u32 %s798_s12, 4  ;;  %vm472_vm15 = vcmask 326656  }
  0x11   : > { %v294_v2 = vrot.slane %v722_v0, 2  ;;  %v295_v3 = vrot.slane %v724_v1, 2  ;;  %v282_v4 = vrot.slane %v722_v0, 1  ;;  %v283_v5 = vrot.slane %v724_v1, 1  ;;  %v733_v6 = vld [vmem:[%s262_s23] sm:$0xff]  ;;  %606 = vmatprep.subr.mxu0 %v387_v23  ;;  %s273_s19 = scalar_lea.vmem %s792_s3, %s595_s16 }
  0x12   : > { %v297_v7 = vrot.slane %v733_v6, 2  ;;  %v306_v8 = vrot.slane %v722_v0, 3  ;;  %v307_v9 = vrot.slane %v724_v1, 3  ;;  %v309_v12 = vrot.slane %v733_v6, 3  ;;  %607 = vmatpush3.msra.mxu0 %v387_v23 }
  0x13   : > { %v296_v10 = vsel %vm293_vm0, %v294_v2, %v295_v3  ;;  %v284_v11 = vsel %vm281_vm1, %v282_v4, %v283_v5  ;;  %v318_v15 = vrot.slane %v722_v0, 4  ;;  %v319_v16 = vrot.slane %v724_v1, 4  ;;  %608 = vmatprep.subr.mxu0 %v386_v29 }
  0x14   : > { %299 = vrot.lane.b32.xlu1 %v296_v10, %s671_s24  ;;  %287 = vrot.lane.b32.xlu0 %v284_v11, %s672_s25  ;;  %v298_v13 = vsel %vm293_vm0, %v295_v3, %v297_v7  ;;  %v308_v14 = vsel %vm305_vm2, %v306_v8, %v307_v9  ;;  %v310_v18 = vsel %vm305_vm2, %v307_v9, %v309_v12  ;;  %v321_v20 = vrot.slane %v733_v6, 4 }
  0x15   : > { %v320_v19 = vsel %vm317_vm3, %v318_v15, %v319_v16  ;;  %v285_v21 = vrot.slane %v733_v6, 1  ;;  %v331_v24 = vrot.slane %v724_v1, 5  ;;  %v333_v27 = vrot.slane %v733_v6, 5  ;;  %609 = vmatpush3.msra.mxu0 %v386_v29 }
  0x16   : > { %v322_v25 = vsel %vm317_vm3, %v319_v16, %v321_v20  ;;  %v330_v28 = vrot.slane %v722_v0, 5  ;;  %v343_v30 = vrot.slane %v724_v1, 6  ;;  %v345_v33 = vrot.slane %v733_v6, 6 }
  0x17   : > { %v286_v26 = vsel %vm281_vm1, %v283_v5, %v285_v21  ;;  %v334_v31 = vsel %vm329_vm4, %v331_v24, %v333_v27  ;;  %v342_v34 = vrot.slane %v722_v0, 6  ;;  %v355_v35 = vrot.slane %v724_v1, 7 }
  0x18   : > { %301 = vrot.lane.b32.xlu1 %v298_v13, %s671_s24  ;;  %311 = vrot.lane.b32.xlu0 %v308_v14, %s673_s28  ;;  %v332_v32 = vsel %vm329_vm4, %v330_v28, %v331_v24  ;;  %v346_v36 = vsel %vm341_vm5, %v343_v30, %v345_v33  ;;  %v357_v38 = vrot.slane %v733_v6, 7  ;;  %v354_v39 = vrot.slane %v722_v0, 7 }
  0x19   : > { %v344_v37 = vsel %vm341_vm5, %v342_v34, %v343_v30 }
  0x1a   : > { %v358_v40 = vsel %vm353_vm6, %v355_v35, %v357_v38  ;;  %v356_v41 = vsel %vm353_vm6, %v354_v39, %v355_v35 }
  0x1c   : > { %313 = vrot.lane.b32.xlu1 %v310_v18, %s673_s28  ;;  %323 = vrot.lane.b32.xlu0 %v320_v19, %s674_s6 }
  0x20   : > { %325 = vrot.lane.b32.xlu1 %v322_v25, %s674_s6  ;;  %289 = vrot.lane.b32.xlu0 %v286_v26, %s672_s25 }
  0x24   : > { %337 = vrot.lane.b32.xlu1 %v334_v31, %s675_s9  ;;  %335 = vrot.lane.b32.xlu0 %v332_v32, %s675_s9 }
  0x28   : > { %349 = vrot.lane.b32.xlu1 %v346_v36, %s676_s10  ;;  %347 = vrot.lane.b32.xlu0 %v344_v37, %s676_s10 }
  0x2c   : > { %361 = vrot.lane.b32.xlu1 %v358_v40, %s677_s11  ;;  %359 = vrot.lane.b32.xlu0 %v356_v41, %s677_s11 }
  0x86   : > { %v300_v42 = vpop.permute.xlu1 %299  ;;  %v288_v43 = vpop.permute.xlu0 %287 }
  0x87   : > { %v366_v54 = vsel %vm365_vm7, %v722_v0, %v288_v43 }
  0x88   : > { %v369_v56 = vsel %vm368_vm8, %v366_v54, %v300_v42 }
  0x8a   : > { %v302_v44 = vpop.permute.xlu1 %301  ;;  %v312_v45 = vpop.permute.xlu0 %311 }
  0x8b   : > { %v372_v60 = vsel %vm371_vm9, %v369_v56, %v312_v45 }
  0x8e   : > { %v314_v46 = vpop.permute.xlu1 %313  ;;  %v324_v47 = vpop.permute.xlu0 %323 }
  0x8f   : > { %v375_v61 = vsel %vm374_vm10, %v372_v60, %v324_v47 }
  0x92   : > { %v326_v48 = vpop.permute.xlu1 %325  ;;  %v290_v49 = vpop.permute.xlu0 %289 }
  0x93   : > { %v367_v50 = vsel %vm365_vm7, %v724_v1, %v290_v49 }
  0x94   : > { %v370_v51 = vsel %vm368_vm8, %v367_v50, %v302_v44 }
  0x95   : > { %v373_v55 = vsel %vm371_vm9, %v370_v51, %v314_v46 }
  0x96   : > { %v338_v52 = vpop.permute.xlu1 %337  ;;  %v336_v53 = vpop.permute.xlu0 %335  ;;  %v376_v57 = vsel %vm374_vm10, %v373_v55, %v326_v48 }
  0x97   : > { %v379_v62 = vsel %vm377_vm11, %v376_v57, %v338_v52  ;;  %v378_v63 = vsel %vm377_vm11, %v375_v61, %v336_v53 }
  0x9a   : > { %v350_v58 = vpop.permute.xlu1 %349  ;;  %v348_v59 = vpop.permute.xlu0 %347 }
  0x9b   : > { %v382_v1 = vsel %vm380_vm12, %v379_v62, %v350_v58  ;;  %v381_v2 = vsel %vm380_vm12, %v378_v63, %v348_v59 }
  0x9e   : > { %v362_v3 = vpop.permute.xlu1 %361  ;;  %v360_v4 = vpop.permute.xlu0 %359 }
  0x9f   : > { %v385_v0 = vsel %vm383_vm13, %v382_v1, %v362_v3  ;;  %v384_v5 = vsel %vm383_vm13, %v381_v2, %v360_v4 }
  0xa0   : > { %610 = vmatprep.mubr.msk.f32.mxu0 %vm390_vm14, %v384_v5 }
  0xa1   : > { %611 = vmatmul.mubr.msk.f32.vlgmr.msra.gmra.mxu0 %vm390_vm14, %v385_v0 }
 0x161   : > { %v612_v6 = vpop.f32.mrf.mxu0 }
 0x162   : > { %474 = vst.msk [vmem:[%s273_s19 + $0x8] sm:$0xff] %vm472_vm15, %v612_v6 }
 0x163   : > { %v463_v7 = vpop.f32.mrf.mxu0 }
 0x164   : > { %473 = vst.msk [vmem:[%s273_s19] sm:$0xff] %vm472_vm15, %v463_v7 }
 0x165 PF: > { %s13_s14 = sadd.s32 1, %s669_s14   ;;  %s793_s12 = smov %s665_s13 }
 0x166   : > { %p10_p5 = scmp.ge.s32.totalorder %s13_s14, 4   ;;  %s794_s13 = smov %s796_s15 }
 0x168   :  { %12 = sbr.rel (!%p10_p5) target bundleno = 2 (0x2), region = 65 }

</bundles_post_ra>
